<compile_context>
chip_gen: v7x
topology: tpu7x:2x2x1
jax: 0.10.0
libtpu: 0.0.40
codegen_flags: <defaults>
</compile_context>

<pallas_src>
import functools
import math

import numpy as np
import jax
import jax.numpy as jnp
from jax.experimental import pallas as pl
from jax.experimental.pallas import tpu as pltpu

_BN_EPS = 1e-5
_BN_S = 1.0 / math.sqrt(1.0 + _BN_EPS)  # eval BN: gamma=1, beta=0, mean=0, var=1
_LN_EPS = 1e-5

_K_SINGLE_MAX = 4096     # use a single full-K block up to this contraction size
_TK = 2048               # K tile if K ever exceeds _K_SINGLE_MAX
_VMEM_LIMIT = 32 * 1024 * 1024   # safe on v5e/v6e/v7x


def _round_up(v, m):
    return ((v + m - 1) // m) * m


def _row_tiles(rows, max_rb=1024):
    """Pick (padded_rows, row_block) for 1-D row-tiled elementwise kernels."""
    rp = _round_up(rows, 16)
    if rp <= max_rb:
        return rp, rp
    rp = _round_up(rows, max_rb)
    return rp, max_rb


# ---------------------------------------------------------------------------
# Core MXU matmul kernel: bf16 operands, f32 accumulation, fused epilogue
# ---------------------------------------------------------------------------
def _mm_kernel(*args, act, has_bias, has_res, multi_k):
    a_ref, b_ref = args[0], args[1]
    idx = 2
    bias_ref = None
    res_ref = None
    if has_bias:
        bias_ref = args[idx]
        idx += 1
    if has_res:
        res_ref = args[idx]
        idx += 1
    o_ref = args[idx]
    idx += 1
    acc_ref = args[idx] if multi_k else None

    def epilogue(r):
        if has_bias:
            r = r + bias_ref[...]
        if has_res:
            r = r + res_ref[...].astype(jnp.float32)
        if act == "relu":
            r = jnp.maximum(r, 0.0)
        elif act == "softmax":
            m = jnp.max(r, axis=-1, keepdims=True)
            e = jnp.exp(r - m)
            r = e / jnp.sum(e, axis=-1, keepdims=True)
        return r

    if not multi_k:
        # full-K single block: no accumulator scratch, direct store
        r = jnp.dot(a_ref[...], b_ref[...], preferred_element_type=jnp.float32)
        o_ref[...] = epilogue(r).astype(o_ref.dtype)
    else:
        @pl.when(pl.program_id(3) == 0)
        def _():
            acc_ref[...] = jnp.zeros_like(acc_ref)

        acc_ref[...] += jnp.dot(a_ref[...], b_ref[...],
                                preferred_element_type=jnp.float32)

        @pl.when(pl.program_id(3) == pl.num_programs(3) - 1)
        def _():
            o_ref[...] = epilogue(acc_ref[...]).astype(o_ref.dtype)


@functools.partial(jax.jit, static_argnames=("act", "out_dtype"))
def pallas_matmul(a, b, bias=None, res=None, *, act=None, out_dtype=jnp.float32):
    """act(A @ B + bias + res).  a: (M,K) or (G,M,K);  b: (K,N) or (G,K,N)."""
    squeeze = a.ndim == 2
    if squeeze:
        a = a[None]
        if res is not None:
            res = res[None]
    if b.ndim == 2:
        b = b[None]
    G, M, K = a.shape
    GB = b.shape[0]
    N = b.shape[-1]

    # M tiling
    if M > 256:
        tm = 256
        Mp = _round_up(M, tm)
    else:
        Mp = _round_up(M, 16)
        tm = Mp
    # N tiling (lane-dense; full-N block when it fits)
    if N < 64:
        Np, tn = 128, 128
    elif N <= 512:
        Np, tn = N, N
    else:
        tn = 512
        Np = _round_up(N, tn)
    # K tiling (full-K single block avoids padding + wasted MXU passes)
    if K <= _K_SINGLE_MAX:
        Kp, tk = K, K
    else:
        tk = _TK
        Kp = _round_up(K, tk)
    nk = Kp // tk
    multi_k = nk > 1

    a = a.astype(jnp.bfloat16)
    b = b.astype(jnp.bfloat16)
    if (Mp, Kp) != (M, K):
        a = jnp.pad(a, ((0, 0), (0, Mp - M), (0, Kp - K)))
    if (Kp, Np) != (K, N):
        b = jnp.pad(b, ((0, 0), (0, Kp - K), (0, Np - N)))

    if act == "softmax":
        # softmax fused in the epilogue requires the full row in one tile
        assert Np == N and tn == Np and bias is None and res is None

    if multi_k:
        grid = (G, Mp // tm, Np // tn, nk)
        a_map = lambda g, i, j, k: (g, i, k)
        b_map = (lambda g, i, j, k: (g, k, j)) if GB > 1 else \
                (lambda g, i, j, k: (0, k, j))
        bias_map = lambda g, i, j, k: (0, j)
        res_map = lambda g, i, j, k: (g, i, j)
        out_map = lambda g, i, j, k: (g, i, j)
        scratch = [pltpu.VMEM((tm, tn), jnp.float32)]
        dims = ("parallel", "parallel", "parallel", "arbitrary")
    else:
        grid = (G, Mp // tm, Np // tn)
        a_map = lambda g, i, j: (g, i, 0)
        b_map = (lambda g, i, j: (g, 0, j)) if GB > 1 else \
                (lambda g, i, j: (0, 0, j))
        bias_map = lambda g, i, j: (0, j)
        res_map = lambda g, i, j: (g, i, j)
        out_map = lambda g, i, j: (g, i, j)
        scratch = []
        dims = ("parallel", "parallel", "parallel")

    in_arrays = [a, b]
    in_specs = [
        pl.BlockSpec((None, tm, tk), a_map),
        pl.BlockSpec((None, tk, tn), b_map),
    ]
    has_bias = bias is not None
    if has_bias:
        bias_arr = bias.reshape(1, -1).astype(jnp.float32)
        if Np != N:
            bias_arr = jnp.pad(bias_arr, ((0, 0), (0, Np - N)))
        in_arrays.append(bias_arr)
        in_specs.append(pl.BlockSpec((1, tn), bias_map))
    has_res = res is not None
    if has_res:
        res = res.astype(jnp.bfloat16)
        if (Mp, Np) != (M, N):
            res = jnp.pad(res, ((0, 0), (0, Mp - M), (0, Np - N)))
        in_arrays.append(res)
        in_specs.append(pl.BlockSpec((None, tm, tn), res_map))

    out = pl.pallas_call(
        functools.partial(_mm_kernel, act=act, has_bias=has_bias,
                          has_res=has_res, multi_k=multi_k),
        out_shape=jax.ShapeDtypeStruct((G, Mp, Np), out_dtype),
        grid_spec=pltpu.PrefetchScalarGridSpec(
            num_scalar_prefetch=0,
            grid=grid,
            in_specs=in_specs,
            out_specs=pl.BlockSpec((None, tm, tn), out_map),
            scratch_shapes=scratch,
        ),
        compiler_params=pltpu.CompilerParams(
            dimension_semantics=dims, vmem_limit_bytes=_VMEM_LIMIT),
    )(*in_arrays)
    out = out[:, :M, :N]
    return out[0] if squeeze else out


# ---------------------------------------------------------------------------
# Row-tiled elementwise kernels
# ---------------------------------------------------------------------------
def _add_kernel(a_ref, b_ref, o_ref):
    o_ref[...] = a_ref[...] + b_ref[...]


@jax.jit
def pallas_add(a, b):
    shape = a.shape
    d = shape[-1]
    a2 = a.reshape(-1, d)
    b2 = b.reshape(-1, d)
    R = a2.shape[0]
    Rp, rb = _row_tiles(R)
    if Rp != R:
        a2 = jnp.pad(a2, ((0, Rp - R), (0, 0)))
        b2 = jnp.pad(b2, ((0, Rp - R), (0, 0)))
    out = pl.pallas_call(
        _add_kernel,
        out_shape=jax.ShapeDtypeStruct((Rp, d), a2.dtype),
        grid_spec=pltpu.PrefetchScalarGridSpec(
            num_scalar_prefetch=0, grid=(Rp // rb,),
            in_specs=[pl.BlockSpec((rb, d), lambda i: (i, 0)),
                      pl.BlockSpec((rb, d), lambda i: (i, 0))],
            out_specs=pl.BlockSpec((rb, d), lambda i: (i, 0))),
        compiler_params=pltpu.CompilerParams(dimension_semantics=("parallel",)),
    )(a2, b2)
    return out[:R].reshape(shape)


def _ln_kernel(x_ref, g_ref, b_ref, o_ref):
    x = x_ref[...]
    mu = jnp.mean(x, axis=-1, keepdims=True)
    xc = x - mu
    var = jnp.mean(xc * xc, axis=-1, keepdims=True)
    o_ref[...] = xc * jax.lax.rsqrt(var + _LN_EPS) * g_ref[...] + b_ref[...]


@jax.jit
def pallas_layernorm(x, gamma, beta):
    shape = x.shape
    d = shape[-1]
    x2 = x.reshape(-1, d)
    R = x2.shape[0]
    Rp, rb = _row_tiles(R)
    if Rp != R:
        x2 = jnp.pad(x2, ((0, Rp - R), (0, 0)))
    out = pl.pallas_call(
        _ln_kernel,
        out_shape=jax.ShapeDtypeStruct((Rp, d), x2.dtype),
        grid_spec=pltpu.PrefetchScalarGridSpec(
            num_scalar_prefetch=0, grid=(Rp // rb,),
            in_specs=[pl.BlockSpec((rb, d), lambda i: (i, 0)),
                      pl.BlockSpec((1, d), lambda i: (0, 0)),
                      pl.BlockSpec((1, d), lambda i: (0, 0))],
            out_specs=pl.BlockSpec((rb, d), lambda i: (i, 0))),
        compiler_params=pltpu.CompilerParams(dimension_semantics=("parallel",)),
    )(x2, gamma.reshape(1, d), beta.reshape(1, d))
    return out[:R].reshape(shape)


def _stack_max_kernel(x_ref, o_ref, *, K):
    acc = x_ref[0]
    for k in range(1, K):
        acc = jnp.maximum(acc, x_ref[k])
    o_ref[...] = acc


@jax.jit
def pallas_stack_max(stack):
    K, M, C = stack.shape
    Mp, rb = _row_tiles(M)
    if Mp != M:
        stack = jnp.pad(stack, ((0, 0), (0, Mp - M), (0, 0)))
    out = pl.pallas_call(
        functools.partial(_stack_max_kernel, K=K),
        out_shape=jax.ShapeDtypeStruct((Mp, C), stack.dtype),
        grid_spec=pltpu.PrefetchScalarGridSpec(
            num_scalar_prefetch=0, grid=(Mp // rb,),
            in_specs=[pl.BlockSpec((K, rb, C), lambda i: (0, i, 0))],
            out_specs=pl.BlockSpec((rb, C), lambda i: (i, 0))),
        compiler_params=pltpu.CompilerParams(dimension_semantics=("parallel",)),
    )(stack)
    return out[:M]


def _avgpool_kernel(x_ref, o_ref, acc_ref, *, inv_hw):
    @pl.when(pl.program_id(1) == 0)
    def _():
        acc_ref[...] = jnp.zeros_like(acc_ref)

    acc_ref[...] += jnp.sum(x_ref[...].astype(jnp.float32), axis=1)

    @pl.when(pl.program_id(1) == pl.num_programs(1) - 1)
    def _():
        o_ref[...] = acc_ref[...] * inv_hw


@jax.jit
def pallas_avgpool(x):
    """Adaptive avg pool to 1x1: (N,H,W,C) -> (N,C) in f32 (tiled over H*W)."""
    N, H, W, C = x.shape
    HW = H * W
    x = x.reshape(N, HW, C)
    nb = 8
    Npad = _round_up(N, nb)
    if HW <= 1024:
        hw_t = _round_up(HW, 8)
    else:
        hw_t = 256
    HWp = _round_up(HW, hw_t)
    if (Npad, HWp) != (N, HW):
        x = jnp.pad(x, ((0, Npad - N), (0, HWp - HW), (0, 0)))
    out = pl.pallas_call(
        functools.partial(_avgpool_kernel, inv_hw=1.0 / HW),
        out_shape=jax.ShapeDtypeStruct((Npad, C), jnp.float32),
        grid_spec=pltpu.PrefetchScalarGridSpec(
            num_scalar_prefetch=0, grid=(Npad // nb, HWp // hw_t),
            in_specs=[pl.BlockSpec((nb, hw_t, C), lambda i, j: (i, j, 0))],
            out_specs=pl.BlockSpec((nb, C), lambda i, j: (i, 0)),
            scratch_shapes=[pltpu.VMEM((nb, C), jnp.float32)]),
        compiler_params=pltpu.CompilerParams(
            dimension_semantics=("parallel", "arbitrary"),
            vmem_limit_bytes=_VMEM_LIMIT),
    )(x)
    return out[:N]


# ---------------------------------------------------------------------------
# Conv / ResNet helpers (MXU matmul with fused epilogue)
# ---------------------------------------------------------------------------
@functools.partial(jax.jit, static_argnames=("stride", "act"))
def conv1x1(x, w, bias=None, stride=1, act=None, res=None):
    if stride > 1:
        x = x[:, ::stride, ::stride, :]
    N, H, W, Cin = x.shape
    y = pallas_matmul(x.reshape(N * H * W, Cin), w, bias, res=res,
                      act=act, out_dtype=jnp.bfloat16)
    return y.reshape(N, H, W, -1)


@functools.partial(jax.jit, static_argnames=("stride", "act"))
def conv3x3(x, w, bias=None, stride=1, act=None, res=None):
    """3x3 conv, pad=1.  w pre-reshaped to (9*Cin, Cout) (bf16, BN folded)."""
    N, H, W, Cin = x.shape
    Ho = (H + 2 - 3) // stride + 1
    Wo = (W + 2 - 3) // stride + 1
    xp = jnp.pad(x, ((0, 0), (1, 1), (1, 1), (0, 0)))
    cols = []
    for i in range(3):
        for j in range(3):
            cols.append(xp[:, i:i + Ho * stride:stride, j:j + Wo * stride:stride, :])
    patches = jnp.concatenate(cols, axis=-1).reshape(N * Ho * Wo, 9 * Cin)
    y = pallas_matmul(patches, w, bias, res=res, act=act, out_dtype=jnp.bfloat16)
    return y.reshape(N, Ho, Wo, -1)


@jax.jit
def maxpool3x3s2(x):
    N, H, W, C = x.shape
    Ho = (H + 2 - 3) // 2 + 1
    Wo = (W + 2 - 3) // 2 + 1
    xp = jnp.pad(x, ((0, 0), (1, 1), (1, 1), (0, 0)), constant_values=-1e30)
    slabs = [xp[:, i:i + Ho * 2:2, j:j + Wo * 2:2, :].reshape(1, N * Ho * Wo, C)
             for i in range(3) for j in range(3)]
    y = pallas_stack_max(jnp.concatenate(slabs, axis=0))
    return y.reshape(N, Ho, Wo, C)


def bottleneck(x, blk):
    s = blk["stride"]
    out = conv1x1(x, blk["w1"], act="relu")
    out = conv3x3(out, blk["w2"], stride=s, act="relu")
    if "wd" in blk:
        identity = conv1x1(x, blk["wd"], stride=s)
    else:
        identity = x
    N, Ho, Wo, _ = out.shape
    # residual add + relu fused into the final conv1x1 epilogue
    return conv1x1(out, blk["w3"], act="relu",
                   res=identity.reshape(N * Ho * Wo, -1))


def resnet_layer(x, blocks):
    for blk in blocks:
        x = bottleneck(x, blk)
    return x


# ---------------------------------------------------------------------------
# TransMIL-style head: TransLayer (Nystrom attention) + PPEG
# ---------------------------------------------------------------------------
def _pinv_kernel(x_ref, z_ref, o_ref, *, iters):
    x = x_ref[...]
    z = z_ref[...]
    n = x.shape[-1]
    eye = (jax.lax.broadcasted_iota(jnp.int32, (n, n), 0) ==
           jax.lax.broadcasted_iota(jnp.int32, (n, n), 1)).astype(x.dtype)
    for _ in range(iters):
        xz = jnp.dot(x, z, preferred_element_type=jnp.float32)
        t1 = 7.0 * eye - xz
        t2 = 15.0 * eye - jnp.dot(xz, t1, preferred_element_type=jnp.float32)
        t3 = 13.0 * eye - jnp.dot(xz, t2, preferred_element_type=jnp.float32)
        z = 0.25 * jnp.dot(z, t3, preferred_element_type=jnp.float32)
    o_ref[...] = z


@functools.partial(jax.jit, static_argnames=("iters",))
def pallas_pinv(x, iters):
    """Moore-Penrose pseudo-inverse via Newton-Schulz, fused per batch*head."""
    G, n1, _ = x.shape
    ax = jnp.abs(x)
    scale = jnp.max(jnp.sum(ax, axis=-1)) * jnp.max(jnp.sum(ax, axis=-2))
    z0 = jnp.swapaxes(x, -1, -2) / scale
    return pl.pallas_call(
        functools.partial(_pinv_kernel, iters=iters),
        out_shape=jax.ShapeDtypeStruct((G, n1, n1), jnp.float32),
        grid_spec=pltpu.PrefetchScalarGridSpec(
            num_scalar_prefetch=0, grid=(G,),
            in_specs=[pl.BlockSpec((None, n1, n1), lambda g: (g, 0, 0)),
                      pl.BlockSpec((None, n1, n1), lambda g: (g, 0, 0))],
            out_specs=pl.BlockSpec((None, n1, n1), lambda g: (g, 0, 0))),
        compiler_params=pltpu.CompilerParams(
            dimension_semantics=("parallel",), vmem_limit_bytes=_VMEM_LIMIT),
    )(x, z0)


def _seq_dwconv_kernel(base_ref, v_ref, w_ref, o_ref, *, K):
    Np = o_ref.shape[0]
    acc = base_ref[...]
    for t in range(K):
        acc = acc + w_ref[pl.ds(t, 1), :] * v_ref[pl.ds(t, Np), :]
    o_ref[...] = acc


@jax.jit
def pallas_seq_dwconv_add(base, v_pad, w_g):
    """base + depthwise 1-D conv along the sequence (per batch*head)."""
    G, Np, dh = base.shape
    K = w_g.shape[1]
    return pl.pallas_call(
        functools.partial(_seq_dwconv_kernel, K=K),
        out_shape=jax.ShapeDtypeStruct((G, Np, dh), base.dtype),
        grid_spec=pltpu.PrefetchScalarGridSpec(
            num_scalar_prefetch=0, grid=(G,),
            in_specs=[pl.BlockSpec((None, Np, dh), lambda g: (g, 0, 0)),
                      pl.BlockSpec((None, Np + K - 1, dh), lambda g: (g, 0, 0)),
                      pl.BlockSpec((None, K, dh), lambda g: (g, 0, 0))],
            out_specs=pl.BlockSpec((None, Np, dh), lambda g: (g, 0, 0))),
        compiler_params=pltpu.CompilerParams(dimension_semantics=("parallel",)),
    )(base, v_pad, w_g)


def nystrom_attention(x, p):
    B, n, dim = x.shape
    heads, dh = 8, dim // 8
    m, iters = dim // 2, 6
    rem = n % m
    if rem > 0:
        x = jnp.pad(x, ((0, 0), (m - rem, 0), (0, 0)))      # pad at the front
    Np = x.shape[1]
    l = Np // m                                              # group size per landmark
    nl = m                                                   # number of landmarks

    qkv = pallas_matmul(x.reshape(B * Np, dim), p["w_qkv"])
    qkv = qkv.reshape(B, Np, 3, heads, dh)
    q = jnp.transpose(qkv[:, :, 0], (0, 2, 1, 3)) * (dh ** -0.5)
    k = jnp.transpose(qkv[:, :, 1], (0, 2, 1, 3))
    v = jnp.transpose(qkv[:, :, 2], (0, 2, 1, 3))

    q_l = q.reshape(B, heads, nl, l, dh).mean(axis=3)
    k_l = k.reshape(B, heads, nl, l, dh).mean(axis=3)

    G = B * heads
    qf = q.reshape(G, Np, dh)
    kf = k.reshape(G, Np, dh)
    vf = v.reshape(G, Np, dh)
    qlf = q_l.reshape(G, nl, dh)
    klf = k_l.reshape(G, nl, dh)

    # softmax fused into the matmul epilogue
    attn1 = pallas_matmul(qf, jnp.swapaxes(klf, 1, 2), act="softmax")
    attn2 = pallas_matmul(qlf, jnp.swapaxes(klf, 1, 2), act="softmax")
    attn3 = pallas_matmul(qlf, jnp.swapaxes(kf, 1, 2), act="softmax")
    attn2_inv = pallas_pinv(attn2, iters)

    out = pallas_matmul(pallas_matmul(attn1, attn2_inv),
                        pallas_matmul(attn3, vf))            # (G, Np, dh)

    # residual depthwise conv on v (kernel 33 along sequence, per head), fused add
    K = p["w_res"].shape[1]
    pad = K // 2
    v_pad = jnp.pad(vf, ((0, 0), (pad, pad), (0, 0)))
    w_g = jnp.broadcast_to(jnp.tile(p["w_res"], (B, 1))[:, :, None], (G, K, dh))
    out = pallas_seq_dwconv_add(out, v_pad, w_g)

    out = jnp.transpose(out.reshape(B, heads, Np, dh),
                        (0, 2, 1, 3)).reshape(B, Np, heads * dh)
    out = pallas_matmul(out.reshape(B * Np, heads * dh), p["w_out"], p["b_out"])
    return out.reshape(B, Np, dim)[:, -n:]


def translayer(x, p):
    y = nystrom_attention(pallas_layernorm(x, p["ln_g"], p["ln_b"]), p)
    return pallas_add(x, y)


def _ppeg_kernel(img_ref, w7_ref, w5_ref, w3_ref, b_ref, o_ref, *, H, W):
    img = img_ref[...]                                  # (H+6, W+6, C)
    acc = img[3:3 + H, 3:3 + W, :] + b_ref[...][None]   # identity + summed bias
    for ksz, wref, base in ((7, w7_ref, 0), (5, w5_ref, 1), (3, w3_ref, 2)):
        for i in range(ksz):
            for j in range(ksz):
                wv = wref[pl.ds(i * ksz + j, 1), :][None]       # (1, 1, C)
                acc = acc + wv * img[base + i:base + i + H, base + j:base + j + W, :]
    o_ref[...] = acc


@jax.jit
def pallas_ppeg(img, w7, w5, w3, bsum):
    """Depthwise 7/5/3 convs + identity, accumulated via shifted taps."""
    # TODO(synk): loads one full padded H x W x C image per sample into VMEM;
    #             very large H, W would need an additional row-tiled grid axis.
    B, H, W, C = img.shape
    imgp = jnp.pad(img, ((0, 0), (3, 3), (3, 3), (0, 0)))
    return pl.pallas_call(
        functools.partial(_ppeg_kernel, H=H, W=W),
        out_shape=jax.ShapeDtypeStruct((B, H, W, C), img.dtype),
        grid_spec=pltpu.PrefetchScalarGridSpec(
            num_scalar_prefetch=0, grid=(B,),
            in_specs=[pl.BlockSpec((None, H + 6, W + 6, C), lambda b: (b, 0, 0, 0)),
                      pl.BlockSpec((49, C), lambda b: (0, 0)),
                      pl.BlockSpec((25, C), lambda b: (0, 0)),
                      pl.BlockSpec((9, C), lambda b: (0, 0)),
                      pl.BlockSpec((1, C), lambda b: (0, 0))],
            out_specs=pl.BlockSpec((None, H, W, C), lambda b: (b, 0, 0, 0))),
        compiler_params=pltpu.CompilerParams(
            dimension_semantics=("parallel",), vmem_limit_bytes=_VMEM_LIMIT),
    )(imgp, w7, w5, w3, bsum)


def ppeg(h, H, W, p):
    B, n, C = h.shape
    cls_tok = h[:, :1]
    img = h[:, 1:].reshape(B, H, W, C)
    out = pallas_ppeg(img, p["w7"], p["w5"], p["w3"], p["b_sum"])
    return jnp.concatenate([cls_tok, out.reshape(B, H * W, C)], axis=1)


# ---------------------------------------------------------------------------
# Parameter init (deterministic, synthetic; weights pre-folded / pre-cast)
# ---------------------------------------------------------------------------
class _KeyGen:
    def __init__(self, seed):
        self.key = jax.random.PRNGKey(seed)

    def __call__(self):
        self.key, sub = jax.random.split(self.key)
        return sub


def _he(key, shape, fan_in):
    return jax.random.normal(key, shape, jnp.float32) * math.sqrt(2.0 / fan_in)


def init_params(seed=42):
    kg = _KeyGen(seed)
    P = {}
    P["conv1_w"] = (_he(kg(), (3, 3, 3, 64), 27) * _BN_S
                    ).reshape(27, 64).astype(jnp.bfloat16)
    P["conv1_b"] = (jnp.zeros((64,), jnp.float32) * _BN_S)

    def make_layer(inplanes, planes, blocks, stride):
        layers = []
        for b in range(blocks):
            s = stride if b == 0 else 1
            cin = inplanes if b == 0 else planes * 4
            blk = {
                "w1": (_he(kg(), (cin, planes), cin) * _BN_S).astype(jnp.bfloat16),
                "w2": (_he(kg(), (3, 3, planes, planes), 9 * planes) * _BN_S
                       ).reshape(9 * planes, planes).astype(jnp.bfloat16),
                "w3": (_he(kg(), (planes, planes * 4), planes) * _BN_S
                       ).astype(jnp.bfloat16),
                "stride": s,
            }
            if b == 0 and (stride != 1 or inplanes != planes * 4):
                blk["wd"] = (_he(kg(), (cin, planes * 4), cin) * _BN_S
                             ).astype(jnp.bfloat16)
            layers.append(blk)
        return layers

    P["layer1"] = make_layer(64, 64, 3, 1)
    P["layer2"] = make_layer(256, 128, 4, 2)
    P["layer3"] = make_layer(512, 256, 6, 2)

    P["fc1_w"] = _he(kg(), (1024, 512), 1024).astype(jnp.bfloat16)
    P["fc1_b"] = jnp.zeros((512,), jnp.float32)
    P["cls_token"] = jax.random.normal(kg(), (1, 1, 512), jnp.float32)

    def translayer_params():
        return {
            "ln_g": jnp.ones((512,), jnp.float32),
            "ln_b": jnp.zeros((512,), jnp.float32),
            "w_qkv": (jax.random.normal(kg(), (512, 3 * 512), jnp.float32)
                      / math.sqrt(512)).astype(jnp.bfloat16),
            "w_out": (jax.random.normal(kg(), (512, 512), jnp.float32)
                      / math.sqrt(512)).astype(jnp.bfloat16),
            "b_out": jnp.zeros((512,), jnp.float32),
            "w_res": jax.random.normal(kg(), (8, 33), jnp.float32) / math.sqrt(33),
        }

    P["trans1"] = translayer_params()
    P["trans2"] = translayer_params()

    b7 = jnp.zeros((512,), jnp.float32)
    b5 = jnp.zeros((512,), jnp.float32)
    b3 = jnp.zeros((512,), jnp.float32)
    P["ppeg"] = {
        "w7": (jax.random.normal(kg(), (7, 7, 512), jnp.float32) / 7.0).reshape(49, 512),
        "w5": (jax.random.normal(kg(), (5, 5, 512), jnp.float32) / 5.0).reshape(25, 512),
        "w3": (jax.random.normal(kg(), (3, 3, 512), jnp.float32) / 3.0).reshape(9, 512),
        "b_sum": (b7 + b5 + b3).reshape(1, 512),
    }
    P["norm_g"] = jnp.ones((512,), jnp.float32)
    P["norm_b"] = jnp.zeros((512,), jnp.float32)
    P["fc2_w"] = (jax.random.normal(kg(), (512, 1), jnp.float32)
                  / math.sqrt(512)).astype(jnp.bfloat16)
    P["fc2_b"] = jnp.zeros((1,), jnp.float32)
    return P


# ---------------------------------------------------------------------------
# RiskModel forward
# ---------------------------------------------------------------------------
def risk_model_forward(x, P):
    """x: (batch_size, num_patch, 3, img_size, img_size) -> ((B, 1), logits)."""
    B, Pn, _, S, _ = x.shape
    x = jnp.transpose(x.reshape(B * Pn, 3, S, S), (0, 2, 3, 1)).astype(jnp.bfloat16)

    # stem: conv1 + BN (folded) + relu + maxpool
    x = conv3x3(x, P["conv1_w"], P["conv1_b"], stride=1, act="relu")
    x = maxpool3x3s2(x)

    x = resnet_layer(x, P["layer1"])
    x = resnet_layer(x, P["layer2"])
    x = resnet_layer(x, P["layer3"])                               # (B*Pn, s, s, 1024)

    N, Hs, Ws, Cf = x.shape
    logits = jnp.transpose(x, (0, 3, 1, 2)).reshape(B, Pn, Cf, Hs, Ws).astype(jnp.float32)

    # adaptive avg pool -> _fc1 (+relu)
    h = pallas_avgpool(x)                                          # (B*Pn, 1024) f32
    h = pallas_matmul(h, P["fc1_w"], P["fc1_b"], act="relu").reshape(B, Pn, 512)

    Hn = h.shape[1]
    _H = _W = int(np.ceil(np.sqrt(Hn)))
    add_length = _H * _W - Hn
    h = jnp.concatenate([h, h[:, :add_length, :]], axis=1)
    cls = jnp.broadcast_to(P["cls_token"], (B, 1, 512))
    h = jnp.concatenate([cls, h], axis=1)                          # (B, 1+_H*_W, 512)

    h = translayer(h, P["trans1"])
    h = ppeg(h, _H, _W, P["ppeg"])
    h = translayer(h, P["trans2"])
    h = pallas_layernorm(h, P["norm_g"], P["norm_b"])[:, 0]        # (B, 512)
    out = pallas_matmul(h, P["fc2_w"], P["fc2_b"])                 # (B, 1)
    return out, logits


def make_forward(params):
    """Compile the whole forward as a single XLA program.

    Params are closed over as constants so static config (strides, block
    structure) stays Python-level; this removes per-op dispatch overhead and
    lets XLA fuse all the glue (pads, im2col concats, transposes) around the
    Pallas kernels.
    """
    return jax.jit(functools.partial(risk_model_forward, P=params))


if __name__ == "__main__":
    key = jax.random.PRNGKey(0)
    x = jax.random.normal(key, (2, 2, 3, 32, 32), dtype=jnp.float32)
    params = init_params(seed=42)

    forward = make_forward(params)
    out, logits = forward(x)
    jax.block_until_ready((out, logits))

    assert out.shape == (2, 1), out.shape
    assert logits.shape == (2, 2, 1024, 4, 4), logits.shape
    assert bool(jnp.all(jnp.isfinite(out)))
    print("KERNEL_OK")
</pallas_src>

<mosaic_0001>
module attributes {stable_mosaic.version = 11 : i64} {
  func.func @_mm_kernel(%arg0: i32, %arg1: i32, %arg2: i32, %arg3: memref<1x256x27xbf16, #tpu.memory_space<vmem>>, %arg4: memref<1x27x64xbf16, #tpu.memory_space<vmem>>, %arg5: memref<1x64xf32, #tpu.memory_space<vmem>>, %arg6: memref<1x256x64xbf16, #tpu.memory_space<vmem>>) attributes {dimension_semantics = [#tpu.dimension_semantics<parallel>, #tpu.dimension_semantics<parallel>, #tpu.dimension_semantics<parallel>], iteration_bounds = array<i64: 1, 16, 1>, scalar_prefetch = 0 : i64, scratch_operands = 0 : i64, tpu.core_type = #tpu.core_type<tc>, window_params = [{transform_indices = @transform_0, window_bounds = array<i64: 1, 256, 27>}, {transform_indices = @transform_1, window_bounds = array<i64: 1, 27, 64>}, {transform_indices = @transform_2, window_bounds = array<i64: 1, 64>}, {transform_indices = @transform_3, window_bounds = array<i64: 1, 256, 64>}]} {
    %c0 = arith.constant 0 : index
    %c0_0 = arith.constant 0 : index
    %c0_1 = arith.constant 0 : index
    %0 = vector.load %arg3[%c0, %c0_0, %c0_1] : memref<1x256x27xbf16, #tpu.memory_space<vmem>>, vector<1x256x27xbf16>
    %1 = vector.shape_cast %0 : vector<1x256x27xbf16> to vector<256x27xbf16>
    %c0_2 = arith.constant 0 : index
    %c0_3 = arith.constant 0 : index
    %c0_4 = arith.constant 0 : index
    %2 = vector.load %arg4[%c0_2, %c0_3, %c0_4] : memref<1x27x64xbf16, #tpu.memory_space<vmem>>, vector<1x27x64xbf16>
    %3 = vector.shape_cast %2 : vector<1x27x64xbf16> to vector<27x64xbf16>
    %cst = arith.constant dense<0.000000e+00> : vector<256x64xf32>
    %4 = tpu.matmul %1, %3, %cst {dimension_numbers = #tpu.dot_dimension_numbers<[1], [0], [0], [1], [0, 0, 1, 1], [], []>} : vector<256x27xbf16>, vector<27x64xbf16>, vector<256x64xf32> -> vector<256x64xf32>
    %c0_5 = arith.constant 0 : index
    %c0_6 = arith.constant 0 : index
    %5 = vector.load %arg5[%c0_5, %c0_6] : memref<1x64xf32, #tpu.memory_space<vmem>>, vector<1x64xf32>
    %6 = vector.broadcast %5 : vector<1x64xf32> to vector<256x64xf32>
    %7 = arith.addf %4, %6 : vector<256x64xf32>
    %cst_7 = arith.constant 0.000000e+00 : f32
    %8 = vector.broadcast %cst_7 : f32 to vector<256x64xf32>
    %9 = arith.maximumf %7, %8 : vector<256x64xf32>
    %10 = arith.truncf %9 : vector<256x64xf32> to vector<256x64xbf16>
    %c0_8 = arith.constant 0 : index
    %c0_9 = arith.constant 0 : index
    %c0_10 = arith.constant 0 : index
    %11 = vector.load %arg6[%c0_8, %c0_9, %c0_10] : memref<1x256x64xbf16, #tpu.memory_space<vmem>>, vector<1x256x64xbf16>
    %12 = vector.shape_cast %11 : vector<1x256x64xbf16> to vector<256x64xbf16>
    %13 = vector.shape_cast %10 : vector<256x64xbf16> to vector<1x256x64xbf16>
    tpu.vector_store %arg6[%c0_8, %c0_9, %c0_10], %13 {strides = array<i32>} : memref<1x256x64xbf16, #tpu.memory_space<vmem>>, vector<1x256x64xbf16>,
    return
  }
  func.func @transform_0(%arg0: i32, %arg1: i32, %arg2: i32) -> (i32, i32, i32) {
    %c0_i32 = arith.constant 0 : i32
    %c0_i32_0 = arith.constant 0 : i32
    return %arg0, %arg1, %c0_i32 : i32, i32, i32
  }
  func.func @transform_1(%arg0: i32, %arg1: i32, %arg2: i32) -> (i32, i32, i32) {
    %c0_i32 = arith.constant 0 : i32
    %c0_i32_0 = arith.constant 0 : i32
    %c0_i32_1 = arith.constant 0 : i32
    return %c0_i32, %c0_i32_0, %arg2 : i32, i32, i32
  }
  func.func @transform_2(%arg0: i32, %arg1: i32, %arg2: i32) -> (i32, i32) {
    %c0_i32 = arith.constant 0 : i32
    %c0_i32_0 = arith.constant 0 : i32
    return %c0_i32, %arg2 : i32, i32
  }
  func.func @transform_3(%arg0: i32, %arg1: i32, %arg2: i32) -> (i32, i32, i32) {
    %c0_i32 = arith.constant 0 : i32
    return %arg0, %arg1, %arg2 : i32, i32, i32
  }
}

</mosaic_0001>

<bundles_post_ra>
// kernel: pallas_matmul.1
= control target key start
LH: loop header
LB: loop body
LE: loop exit
PB: predicated region body
PF: predicated region fallthrough
CT: control target
= control target key end

     0   :  { %s1186_s12 = smov 0   ;;  %s1188_s13 = smov 0   ;;  %s1369_s0 = inlined_call_operand.vmem [shape: bf16[1,4096,27], index: 0, kind: input, shape index: {}]   ;;  %s1370_s1 = inlined_call_operand.vmem [shape: bf16[1,27,64], index: 1, kind: input, shape index: {}]   ;;  %s1371_s2 = inlined_call_operand.vmem [shape: f32[1,64], index: 2, kind: input, shape index: {}]   ;;  %s1372_s3 = inlined_call_operand.vmem [shape: bf16[1,4096,64], index: 3, kind: output, shape index: {}]  }
   0x1   :  { %s1190_s14 = smov 0  }
   0x2 LB: > { %s28_s15 = sadd.s32 1, %s1159_s13  ;;  %p934_p0 = scmp.ge.s32.totalorder %s1163_s14, 1  ;;  %s1163_s14 = sphi %s1190_s14, %s13_s14   ;;  %s1159_s13 = sphi %s1188_s13, %s1374_s13   ;;  %s1155_s12 = sphi %s1186_s12, %s1373_s12  }
   0x3   : > { %p30_p1 = scmp.ge.s32.totalorder %s28_s15, 16  ;;  %p184_p2 = scmp.lt.s32.totalorder %s1163_s14, 17 }
   0x5   : > { %s1376_s15 = smov (%p30_p1, %s28_s15), 0  ;;  %p185_p3 = pnand %p934_p0, %p184_p2 }
   0x6   : > { %v1123_v0 = vld [vmem:[%s1370_s1] sm:$0xff] (!%p185_p3)   ;;  %vm440_vm0 = vcmask (!%p185_p3), 1044480   ;;  %v1124_v1 = vld [vmem:[%s1370_s1 + $0x8] sm:$0x3f] (!%p185_p3)   ;;  %vm441_vm1 = vcmask (!%p185_p3), 1045504   ;;  %s935_s20 = sshll.u32 (!%p185_p3), %s1155_s12, 5 }
   0x7   : > { %188 = sbr.rel (%p185_p3) target bundleno = 266 (0x10a), region = 32  ;;  %1058 = vmatprep.subr.bf16.mxu0 (!%p185_p3), %v1123_v0  ;;  %1094 = vmatprep.subr.bf16.mxu1 (!%p185_p3), %v1123_v0  ;;  %v1165_v2 = vmov (!%p185_p3), 65535   ;;  %p229_p4 = scmp.lt.s32.totalorder (!%p185_p3), %s935_s20, 511  ;;  %vm391_vm2 = vcmask (!%p185_p3), 220160   ;;  %v1255_v22 = vld [vmem:[%s1371_s2] ss:$0 sm:$0xff] (!%p185_p3) }
   0x8   : > { %1059 = vmatpush3.bf16.msra.mxu0 (!%p185_p3), %v1123_v0  ;;  %1096 = vmatpush3.bf16.msra.mxu1 (!%p185_p3), %v1123_v0  ;;  %v442_v3 = vsel (!%p185_p3), %vm440_vm0, 4294967295, %v1165_v2  ;;  %vm768_vm3 = vcmask (!%p185_p3), 519168  }
   0x9   : > { %v443_v4 = vsel (!%p185_p3), %vm441_vm1, %v442_v3, 0 }
   0xa   : > { %v445_v5 = vand.u32 (!%p185_p3), %v1124_v1, %v443_v4 }
   0xc   : > { %1060 = vmatprep.subr.bf16.mxu0 (!%p185_p3), %v445_v5  ;;  %1095 = vmatprep.subr.bf16.mxu1 (!%p185_p3), %v445_v5 }
   0xd   : > { %1061 = vmatpush3.bf16.msra.mxu0 (!%p185_p3), %v445_v5  ;;  %1097 = vmatpush3.bf16.msra.mxu1 (!%p185_p3), %v445_v5 }
   0xe   : > { %s1378_s20 = smov (!%p229_p4, %s935_s20), 511 }
   0xf   : > { %s936_s21 = sshll.u32 %s1378_s20, 2 }
  0x10   : > { %s1218_s24 = scalar_lea.vmem %s1369_s0, %s936_s21  ;;  %s1267_s29 = scalar_lea.vmem %s1372_s3, %s936_s21 }
  0x11   : > { %v1125_v6 = vld [vmem:[%s1218_s24] sm:$0xff]   ;;  %v1127_v8 = vld [vmem:[%s1218_s24 + $0x8] sm:$0xff]   ;;  %v1129_v10 = vld [vmem:[%s1218_s24 + $0x10] sm:$0xff]  }
  0x12   : > { %v1126_v7 = vld [vmem:[%s1218_s24 + $0x40] sm:$0xff]   ;;  %1062 = vmatprep.mubr.msk.bf16.mxu0 %vm391_vm2, %v1125_v6  ;;  %v1128_v9 = vld [vmem:[%s1218_s24 + $0x48] sm:$0xff]   ;;  %v1130_v11 = vld [vmem:[%s1218_s24 + $0x50] sm:$0xff]  }
  0x13   : > { %1078 = vmatprep.mubr.msk.bf16.mxu1 %vm391_vm2, %v1126_v7  ;;  %1063 = vmatmul.mubr.msk.bf16.vlgmr.msra.gmra.mrb[0].mxu0 %vm391_vm2, %v1127_v8  ;;  %v1131_v12 = vld [vmem:[%s1218_s24 + $0x18] sm:$0xff]   ;;  %v1133_v14 = vld [vmem:[%s1218_s24 + $0x20] sm:$0xff]   ;;  %v1135_v16 = vld [vmem:[%s1218_s24 + $0x28] sm:$0xff]  }
  0x14   : > { %1079 = vmatmul.mubr.msk.bf16.vlgmr.msra.gmra.mrb[0].mxu1 %vm391_vm2, %v1128_v9  ;;  %1066 = vmatprep.mubr.msk.bf16.mxu0 %vm391_vm2, %v1129_v10  ;;  %v1132_v13 = vld [vmem:[%s1218_s24 + $0x58] sm:$0xff]   ;;  %v1134_v15 = vld [vmem:[%s1218_s24 + $0x60] sm:$0xff]   ;;  %v1136_v17 = vld [vmem:[%s1218_s24 + $0x68] sm:$0xff]  }
  0x15   : > { %1082 = vmatprep.mubr.msk.bf16.mxu1 %vm391_vm2, %v1130_v11  ;;  %v1137_v18 = vld [vmem:[%s1218_s24 + $0x30] sm:$0xff]   ;;  %v1139_v20 = vld [vmem:[%s1218_s24 + $0x38] sm:$0xff]  }
  0x16   : > { %v1138_v19 = vld [vmem:[%s1218_s24 + $0x70] sm:$0xff]   ;;  %v1140_v21 = vld [vmem:[%s1218_s24 + $0x78] sm:$0xff]  }
  0x1b   : > { %1067 = vmatmul.mubr.msk.bf16.gmra.mrb[4].mxu0 %vm391_vm2, %v1131_v12 }
  0x1c   : > { %1083 = vmatmul.mubr.msk.bf16.gmra.mrb[4].mxu1 %vm391_vm2, %v1132_v13  ;;  %1070 = vmatprep.mubr.msk.bf16.mxu0 %vm391_vm2, %v1133_v14 }
  0x1d   : > { %1086 = vmatprep.mubr.msk.bf16.mxu1 %vm391_vm2, %v1134_v15 }
  0x23   : > { %1071 = vmatmul.mubr.msk.bf16.gmra.mrb[8].mxu0 %vm391_vm2, %v1135_v16 }
  0x24   : > { %1087 = vmatmul.mubr.msk.bf16.gmra.mrb[8].mxu1 %vm391_vm2, %v1136_v17  ;;  %1074 = vmatprep.mubr.msk.bf16.mxu0 %vm391_vm2, %v1137_v18 }
  0x25   : > { %1090 = vmatprep.mubr.msk.bf16.mxu1 %vm391_vm2, %v1138_v19 }
  0x2b   : > { %1075 = vmatmul.mubr.msk.bf16.gmra.mrb[12].mxu0 %vm391_vm2, %v1139_v20 }
  0x2c   : > { %1091 = vmatmul.mubr.msk.bf16.gmra.mrb[12].mxu1 %vm391_vm2, %v1140_v21 }
  0xe6   : > { %v1064_v23 = vpop.f32.mrb[0].mxu0 }
  0xe7   : > { %v490_v24 = vadd.f32 %v1064_v23, %v1255_v22  ;;  %v1080_v25 = vpop.f32.mrb[0].mxu1  ;;  %v481_v26 = vpop.f32.mrb[1].mxu0 }
  0xe8   : > { %v554_v27 = vadd.f32 %v1080_v25, %v1255_v22  ;;  %v482_v28 = vadd.f32 %v1255_v22, %v481_v26  ;;  %v545_v29 = vpop.f32.mrb[1].mxu1  ;;  %v1065_v30 = vpop.f32.mrb[2].mxu0 }
  0xe9   : > { %v610_v31 = vmax.f32 %v490_v24, 0.0  ;;  %v546_v32 = vadd.f32 %v1255_v22, %v545_v29  ;;  %v493_v33 = vadd.f32 %v1065_v30, %v1255_v22  ;;  %v1081_v34 = vpop.f32.mrb[2].mxu1  ;;  %v484_v35 = vpop.f32.mrb[3].mxu0 }
  0xea   : > { %v626_v36 = vmax.f32 %v554_v27, 0.0  ;;  %v608_v37 = vmax.f32 %v482_v28, 0.0  ;;  %v557_v38 = vadd.f32 %v1081_v34, %v1255_v22  ;;  %v485_v39 = vadd.f32 %v1255_v22, %v484_v35  ;;  %v548_v40 = vpop.f32.mrb[3].mxu1 }
  0xeb   : > { %v1010_v41 = vpack.c.bf16 %v610_v31, %v610_v31  ;;  %v624_v42 = vmax.f32 %v546_v32, 0.0  ;;  %v611_v43 = vmax.f32 %v493_v33, 0.0  ;;  %v549_v44 = vadd.f32 %v1255_v22, %v548_v40 }
  0xec   : > { %v1026_v45 = vpack.c.bf16 %v626_v36, %v626_v36  ;;  %v1008_v46 = vpack.c.bf16 %v608_v37, %v608_v37  ;;  %v627_v47 = vmax.f32 %v557_v38, 0.0  ;;  %v609_v48 = vmax.f32 %v485_v39, 0.0 }
  0xed   : > { %771 = vst.msk [vmem:[%s1267_s29 + $0x8] sm:$0xf] %vm768_vm3, %v1010_v41  ;;  %v1024_v49 = vpack.c.bf16 %v624_v42, %v624_v42  ;;  %v1011_v50 = vpack.c.bf16 %v611_v43, %v611_v43  ;;  %v625_v51 = vmax.f32 %v549_v44, 0.0 }
  0xee   : > { %787 = vst.msk [vmem:[%s1267_s29 + $0x48] sm:$0xf] %vm768_vm3, %v1026_v45  ;;  %769 = vst.msk [vmem:[%s1267_s29] sm:$0xf] %vm768_vm3, %v1008_v46  ;;  %v1027_v52 = vpack.c.bf16 %v627_v47, %v627_v47  ;;  %v1009_v53 = vpack.c.bf16 %v609_v48, %v609_v48  ;;  %v1068_v54 = vpop.f32.mrb[4].mxu0 }
  0xef   : > { %785 = vst.msk [vmem:[%s1267_s29 + $0x40] sm:$0xf] %vm768_vm3, %v1024_v49  ;;  %772 = vst.msk [vmem:[%s1267_s29 + $0xc] sm:$0xf] %vm768_vm3, %v1011_v50  ;;  %v1025_v55 = vpack.c.bf16 %v625_v51, %v625_v51  ;;  %v506_v56 = vadd.f32 %v1068_v54, %v1255_v22  ;;  %v1084_v57 = vpop.f32.mrb[4].mxu1  ;;  %v497_v58 = vpop.f32.mrb[5].mxu0 }
  0xf0   : > { %788 = vst.msk [vmem:[%s1267_s29 + $0x4c] sm:$0xf] %vm768_vm3, %v1027_v52  ;;  %770 = vst.msk [vmem:[%s1267_s29 + $0x4] sm:$0xf] %vm768_vm3, %v1009_v53  ;;  %v570_v59 = vadd.f32 %v1084_v57, %v1255_v22  ;;  %v498_v60 = vadd.f32 %v1255_v22, %v497_v58  ;;  %v561_v61 = vpop.f32.mrb[5].mxu1  ;;  %v1069_v62 = vpop.f32.mrb[6].mxu0 }
  0xf1   : > { %786 = vst.msk [vmem:[%s1267_s29 + $0x44] sm:$0xf] %vm768_vm3, %v1025_v55  ;;  %v614_v63 = vmax.f32 %v506_v56, 0.0  ;;  %v562_v0 = vadd.f32 %v1255_v22, %v561_v61  ;;  %v509_v1 = vadd.f32 %v1069_v62, %v1255_v22  ;;  %v1085_v2 = vpop.f32.mrb[6].mxu1  ;;  %v500_v3 = vpop.f32.mrb[7].mxu0 }
  0xf2   : > { %v630_v4 = vmax.f32 %v570_v59, 0.0  ;;  %v612_v5 = vmax.f32 %v498_v60, 0.0  ;;  %v573_v6 = vadd.f32 %v1085_v2, %v1255_v22  ;;  %v501_v7 = vadd.f32 %v1255_v22, %v500_v3  ;;  %v564_v8 = vpop.f32.mrb[7].mxu1 }
  0xf3   : > { %v1014_v9 = vpack.c.bf16 %v614_v63, %v614_v63  ;;  %v628_v10 = vmax.f32 %v562_v0, 0.0  ;;  %v615_v11 = vmax.f32 %v509_v1, 0.0  ;;  %v565_v12 = vadd.f32 %v1255_v22, %v564_v8 }
  0xf4   : > { %v1030_v13 = vpack.c.bf16 %v630_v4, %v630_v4  ;;  %v1012_v14 = vpack.c.bf16 %v612_v5, %v612_v5  ;;  %v631_v15 = vmax.f32 %v573_v6, 0.0  ;;  %v613_v16 = vmax.f32 %v501_v7, 0.0 }
  0xf5   : > { %775 = vst.msk [vmem:[%s1267_s29 + $0x18] sm:$0xf] %vm768_vm3, %v1014_v9  ;;  %v1028_v17 = vpack.c.bf16 %v628_v10, %v628_v10  ;;  %v1015_v18 = vpack.c.bf16 %v615_v11, %v615_v11  ;;  %v629_v19 = vmax.f32 %v565_v12, 0.0 }
  0xf6   : > { %791 = vst.msk [vmem:[%s1267_s29 + $0x58] sm:$0xf] %vm768_vm3, %v1030_v13  ;;  %773 = vst.msk [vmem:[%s1267_s29 + $0x10] sm:$0xf] %vm768_vm3, %v1012_v14  ;;  %v1031_v20 = vpack.c.bf16 %v631_v15, %v631_v15  ;;  %v1013_v21 = vpack.c.bf16 %v613_v16, %v613_v16  ;;  %v1072_v23 = vpop.f32.mrb[8].mxu0 }
  0xf7   : > { %789 = vst.msk [vmem:[%s1267_s29 + $0x50] sm:$0xf] %vm768_vm3, %v1028_v17  ;;  %776 = vst.msk [vmem:[%s1267_s29 + $0x1c] sm:$0xf] %vm768_vm3, %v1015_v18  ;;  %v1029_v24 = vpack.c.bf16 %v629_v19, %v629_v19  ;;  %v522_v25 = vadd.f32 %v1072_v23, %v1255_v22  ;;  %v1088_v26 = vpop.f32.mrb[8].mxu1  ;;  %v513_v27 = vpop.f32.mrb[9].mxu0 }
  0xf8   : > { %792 = vst.msk [vmem:[%s1267_s29 + $0x5c] sm:$0xf] %vm768_vm3, %v1031_v20  ;;  %774 = vst.msk [vmem:[%s1267_s29 + $0x14] sm:$0xf] %vm768_vm3, %v1013_v21  ;;  %v586_v28 = vadd.f32 %v1088_v26, %v1255_v22  ;;  %v514_v29 = vadd.f32 %v1255_v22, %v513_v27  ;;  %v577_v30 = vpop.f32.mrb[9].mxu1  ;;  %v1073_v31 = vpop.f32.mrb[10].mxu0 }
  0xf9   : > { %790 = vst.msk [vmem:[%s1267_s29 + $0x54] sm:$0xf] %vm768_vm3, %v1029_v24  ;;  %v618_v32 = vmax.f32 %v522_v25, 0.0  ;;  %v578_v33 = vadd.f32 %v1255_v22, %v577_v30  ;;  %v525_v34 = vadd.f32 %v1073_v31, %v1255_v22  ;;  %v1089_v35 = vpop.f32.mrb[10].mxu1  ;;  %v516_v36 = vpop.f32.mrb[11].mxu0 }
  0xfa   : > { %v634_v37 = vmax.f32 %v586_v28, 0.0  ;;  %v616_v38 = vmax.f32 %v514_v29, 0.0  ;;  %v589_v39 = vadd.f32 %v1089_v35, %v1255_v22  ;;  %v517_v40 = vadd.f32 %v1255_v22, %v516_v36  ;;  %v580_v41 = vpop.f32.mrb[11].mxu1 }
  0xfb   : > { %v1018_v42 = vpack.c.bf16 %v618_v32, %v618_v32  ;;  %v632_v43 = vmax.f32 %v578_v33, 0.0  ;;  %v619_v44 = vmax.f32 %v525_v34, 0.0  ;;  %v581_v45 = vadd.f32 %v1255_v22, %v580_v41 }
  0xfc   : > { %v1034_v46 = vpack.c.bf16 %v634_v37, %v634_v37  ;;  %v1016_v47 = vpack.c.bf16 %v616_v38, %v616_v38  ;;  %v635_v48 = vmax.f32 %v589_v39, 0.0  ;;  %v617_v49 = vmax.f32 %v517_v40, 0.0 }
  0xfd   : > { %779 = vst.msk [vmem:[%s1267_s29 + $0x28] sm:$0xf] %vm768_vm3, %v1018_v42  ;;  %v1032_v50 = vpack.c.bf16 %v632_v43, %v632_v43  ;;  %v1019_v51 = vpack.c.bf16 %v619_v44, %v619_v44  ;;  %v633_v52 = vmax.f32 %v581_v45, 0.0 }
  0xfe   : > { %795 = vst.msk [vmem:[%s1267_s29 + $0x68] sm:$0xf] %vm768_vm3, %v1034_v46  ;;  %777 = vst.msk [vmem:[%s1267_s29 + $0x20] sm:$0xf] %vm768_vm3, %v1016_v47  ;;  %v1035_v53 = vpack.c.bf16 %v635_v48, %v635_v48  ;;  %v1017_v54 = vpack.c.bf16 %v617_v49, %v617_v49  ;;  %v1076_v55 = vpop.f32.mrb[12].mxu0 }
  0xff   : > { %793 = vst.msk [vmem:[%s1267_s29 + $0x60] sm:$0xf] %vm768_vm3, %v1032_v50  ;;  %780 = vst.msk [vmem:[%s1267_s29 + $0x2c] sm:$0xf] %vm768_vm3, %v1019_v51  ;;  %v1033_v56 = vpack.c.bf16 %v633_v52, %v633_v52  ;;  %v538_v57 = vadd.f32 %v1076_v55, %v1255_v22  ;;  %v1092_v58 = vpop.f32.mrb[12].mxu1  ;;  %v529_v59 = vpop.f32.mrb[13].mxu0 }
 0x100   : > { %796 = vst.msk [vmem:[%s1267_s29 + $0x6c] sm:$0xf] %vm768_vm3, %v1035_v53  ;;  %778 = vst.msk [vmem:[%s1267_s29 + $0x24] sm:$0xf] %vm768_vm3, %v1017_v54  ;;  %v602_v60 = vadd.f32 %v1092_v58, %v1255_v22  ;;  %v530_v61 = vadd.f32 %v1255_v22, %v529_v59  ;;  %v593_v62 = vpop.f32.mrb[13].mxu1  ;;  %v1077_v63 = vpop.f32.mrb[14].mxu0 }
 0x101   : > { %794 = vst.msk [vmem:[%s1267_s29 + $0x64] sm:$0xf] %vm768_vm3, %v1033_v56  ;;  %v622_v0 = vmax.f32 %v538_v57, 0.0  ;;  %v594_v1 = vadd.f32 %v1255_v22, %v593_v62  ;;  %v541_v2 = vadd.f32 %v1077_v63, %v1255_v22  ;;  %v1093_v3 = vpop.f32.mrb[14].mxu1  ;;  %v532_v4 = vpop.f32.mrb[15].mxu0 }
 0x102   : > { %v638_v5 = vmax.f32 %v602_v60, 0.0  ;;  %v620_v6 = vmax.f32 %v530_v61, 0.0  ;;  %v605_v7 = vadd.f32 %v1093_v3, %v1255_v22  ;;  %v533_v8 = vadd.f32 %v1255_v22, %v532_v4  ;;  %v596_v9 = vpop.f32.mrb[15].mxu1 }
 0x103   : > { %v1022_v10 = vpack.c.bf16 %v622_v0, %v622_v0  ;;  %v636_v11 = vmax.f32 %v594_v1, 0.0  ;;  %v623_v12 = vmax.f32 %v541_v2, 0.0  ;;  %v597_v13 = vadd.f32 %v1255_v22, %v596_v9 }
 0x104   : > { %v1038_v14 = vpack.c.bf16 %v638_v5, %v638_v5  ;;  %v1020_v15 = vpack.c.bf16 %v620_v6, %v620_v6  ;;  %v639_v16 = vmax.f32 %v605_v7, 0.0  ;;  %v621_v17 = vmax.f32 %v533_v8, 0.0 }
 0x105   : > { %783 = vst.msk [vmem:[%s1267_s29 + $0x38] sm:$0xf] %vm768_vm3, %v1022_v10  ;;  %v1036_v18 = vpack.c.bf16 %v636_v11, %v636_v11  ;;  %v1023_v19 = vpack.c.bf16 %v623_v12, %v623_v12  ;;  %v637_v20 = vmax.f32 %v597_v13, 0.0 }
 0x106   : > { %799 = vst.msk [vmem:[%s1267_s29 + $0x78] sm:$0xf] %vm768_vm3, %v1038_v14  ;;  %781 = vst.msk [vmem:[%s1267_s29 + $0x30] sm:$0xf] %vm768_vm3, %v1020_v15  ;;  %v1039_v21 = vpack.c.bf16 %v639_v16, %v639_v16  ;;  %v1021_v23 = vpack.c.bf16 %v621_v17, %v621_v17 }
 0x107   : > { %797 = vst.msk [vmem:[%s1267_s29 + $0x70] sm:$0xf] %vm768_vm3, %v1036_v18  ;;  %784 = vst.msk [vmem:[%s1267_s29 + $0x3c] sm:$0xf] %vm768_vm3, %v1023_v19  ;;  %v1037_v22 = vpack.c.bf16 %v637_v20, %v637_v20 }
 0x108   : > { %800 = vst.msk [vmem:[%s1267_s29 + $0x7c] sm:$0xf] %vm768_vm3, %v1039_v21  ;;  %782 = vst.msk [vmem:[%s1267_s29 + $0x34] sm:$0xf] %vm768_vm3, %v1021_v23 }
 0x109   : > { %798 = vst.msk [vmem:[%s1267_s29 + $0x74] sm:$0xf] %vm768_vm3, %v1037_v22 }
 0x10a PF: > { %s13_s14 = sadd.s32 1, %s1163_s14   ;;  %s1373_s12 = smov %s1159_s13 }
 0x10b   : > { %p10_p5 = scmp.ge.s32.totalorder %s13_s14, 18   ;;  %s1374_s13 = smov %s1376_s15 }
 0x10d   :  { %12 = sbr.rel (!%p10_p5) target bundleno = 2 (0x2), region = 68 }

</bundles_post_ra>
